<compile_context>
chip_gen: v5e
topology: v5e:2x2
jax: 0.10.0
libtpu: 0.0.40
codegen_flags: <defaults>
</compile_context>

<pallas_src>
import functools

import jax
import jax.numpy as jnp
from jax import lax
from jax.experimental import pallas as pl
from jax.experimental.pallas import tpu as pltpu  # noqa: F401  (TPU backend)

MOTION_SCALE = 0.01


# ----------------------------- Pallas kernels --------------------------------
def _pose_trunk_kernel_segpool(x9_ref, w1_ref, w2_ref, b2_ref, w3_ref, b3_ref,
                               o_ref, *, bs, hw):
    # x9_ref: (M, 9*Cin + 9)   9 shifted input taps + 9 tap-validity columns
    # w1_ref: (9*Cin + 9, 9*F) block-diag 1x1 weight stacked over per-tap b1
    # w2_ref: (9*F, F)         3x3-conv weight flattened for im2col
    # b2_ref: (1, F)
    # w3_ref: (F, Cout)        final 1x1-conv weight
    # b3_ref: (1, Cout)
    # o_ref:  (bs, Cout)       pooled logits (single lane-contiguous store)

    # Conv2d(Cin, F, k=1) + bias + ReLU for all 9 taps in one MXU pass.
    # Bias is folded into the matmul via the validity columns of x9_aug.
    y1 = jnp.maximum(
        jnp.dot(x9_ref[...], w1_ref[...], preferred_element_type=jnp.float32),
        0.0)                                                       # (M, 9F)

    # Conv2d(F, F, k=3, pad=1) + ReLU as a single im2col matmul (K = 9F).
    y2 = jnp.maximum(
        jnp.dot(y1, w2_ref[...], preferred_element_type=jnp.float32)
        + b2_ref[...], 0.0)                                        # (M, F)

    # adaptive_avg_pool2d((1,1)), pulled in front of the (linear) final conv:
    # segmented mean over tile-aligned per-sample row blocks (hw % 8 == 0),
    # runs on sublane-reduction slots with slack relative to the MXU.
    segs = [jnp.sum(y2[b * hw:(b + 1) * hw, :], axis=0, keepdims=True)
            for b in range(bs)]
    pooled = jnp.concatenate(segs, axis=0) * (1.0 / hw)            # (bs, F)

    # Conv2d(F, 6*num_src, k=1) on the pooled features.
    o_ref[...] = (jnp.dot(pooled, w3_ref[...],
                          preferred_element_type=jnp.float32)
                  + b3_ref[...])                                   # (bs, Cout)


def _pose_trunk_kernel_matpool(x9_ref, w1_ref, w2_ref, b2_ref, pool_ref,
                               w3_ref, b3_ref, o_ref):
    # Fallback for HW % 8 != 0 (segment boundaries not sublane-tile aligned):
    # pooling via a per-sample averaging matmul.
    y1 = jnp.maximum(
        jnp.dot(x9_ref[...], w1_ref[...], preferred_element_type=jnp.float32),
        0.0)
    y2 = jnp.maximum(
        jnp.dot(y1, w2_ref[...], preferred_element_type=jnp.float32)
        + b2_ref[...], 0.0)
    pooled = jnp.dot(pool_ref[...], y2, preferred_element_type=jnp.float32)
    o_ref[...] = (jnp.dot(pooled, w3_ref[...],
                          preferred_element_type=jnp.float32)
                  + b3_ref[...])


# --------------------- one-time (hoisted) preprocessing ----------------------
def preprocess_pose_decoder_params(params, bs, H, W):
    """Weight/shape-only preprocessing, run ONCE and reused across forwards."""
    w1, b1, w2, b2, w3, b3 = (params[k] for k in ("w1", "b1", "w2", "b2", "w3", "b3"))
    Cin, F = w1.shape
    HW = H * W
    M = bs * HW

    eye9 = jnp.eye(9, dtype=jnp.float32)
    # Block-diagonal first-conv weight (input tap k -> output block k), with
    # the first-conv bias folded in as 9 extra rows (row k carries b1 in
    # column block k).  K goes 9*Cin -> 9*Cin + 9, negligible on the MXU.
    w1_aug = jnp.concatenate(
        [jnp.kron(eye9, w1.astype(jnp.float32)),            # (9*Cin, 9*F)
         jnp.kron(eye9, b1.astype(jnp.float32))], axis=0)   # (9,     9*F)

    # im2col-flattened 3x3 weight; (tap, cin) row order matches x9 / w1_aug.
    w2_flat = w2.reshape(9 * F, F).astype(jnp.float32)

    # Tap-validity indicator (shape-only): 0 where a 3x3 tap falls in the
    # zero-padding region, 1 inside the image.  Tap order k = (dy+1)*3+(dx+1).
    r = jnp.arange(M)
    h = (r % HW) // W
    w = r % W
    valid = jnp.stack(
        [((h + dy >= 0) & (h + dy < H) & (w + dx >= 0) & (w + dx < W))
         for dy in (-1, 0, 1) for dx in (-1, 0, 1)],
        axis=1).astype(jnp.float32)                         # (M, 9)

    prep = {
        "w1_aug": w1_aug,
        "w2_flat": w2_flat,
        "b2": b2.astype(jnp.float32),
        "w3": w3.astype(jnp.float32),
        "b3": b3.astype(jnp.float32),
        "valid": valid,
    }
    if HW % 8 != 0:
        # Fallback pooling matrix (only when segments aren't sublane aligned).
        prep["pool"] = (jnp.arange(M)[None, :] // HW
                        == jnp.arange(bs)[:, None]).astype(jnp.float32) / HW
    return prep


# ------------------------------ JAX glue -------------------------------------
def euler_xyz_to_matrix(angles):
    """pytorch3d euler_angles_to_matrix(angles, 'XYZ'): R = Rx @ Ry @ Rz."""
    ax, ay, az = angles[:, 0], angles[:, 1], angles[:, 2]
    one = jnp.ones_like(ax)
    zero = jnp.zeros_like(ax)
    cx, sx = jnp.cos(ax), jnp.sin(ax)
    cy, sy = jnp.cos(ay), jnp.sin(ay)
    cz, sz = jnp.cos(az), jnp.sin(az)
    Rx = jnp.stack([one, zero, zero,
                    zero, cx, -sx,
                    zero, sx, cx], axis=-1).reshape(-1, 3, 3)
    Ry = jnp.stack([cy, zero, sy,
                    zero, one, zero,
                    -sy, zero, cy], axis=-1).reshape(-1, 3, 3)
    Rz = jnp.stack([cz, -sz, zero,
                    sz, cz, zero,
                    zero, zero, one], axis=-1).reshape(-1, 3, 3)
    return jnp.einsum('nij,njk,nkl->nil', Rx, Ry, Rz)


def pose_from_pooled(pooled):
    """pooled: (bs, 6*num_src) -> (bs*num_src, 4, 4) relative camera motion."""
    bs, c = pooled.shape
    n = (bs * c) // 6
    outs = pooled.reshape(n, 6) * MOTION_SCALE
    r = outs[:, :3]                       # torch.squeeze is a no-op for n > 1
    t = outs[:, 3:].reshape(n, 3, 1)
    R = euler_xyz_to_matrix(r)
    T = jnp.concatenate([R, t], axis=2)                        # (n, 3, 4)
    last_row = jnp.zeros((n, 1, 4), jnp.float32).at[:, 0, 3].set(1.0)
    return jnp.concatenate([T, last_row], axis=1)              # (n, 4, 4)


# ------------------------------ forward path ---------------------------------
@jax.jit
def pose_decoder_v2(x_nchw, prep):
    """x_nchw: (bs, Cin, H, W); prep: output of preprocess_pose_decoder_params.

    Returns (bs*num_src, 4, 4) relative camera motion (same as PyTorch module).
    """
    bs, Cin, H, W = x_nchw.shape
    HW = H * W
    M = bs * HW
    Cout = prep["w3"].shape[1]

    # --- per-call layout plumbing: 9 shifted, zero-padded taps of the input.
    # TODO(synk): for large Cin, apply conv1 once and build the 9 taps
    # in-kernel with pltpu.roll instead of the 9x channel expansion.
    x_nhwc = jnp.transpose(x_nchw, (0, 2, 3, 1))
    xp = jnp.pad(x_nhwc, ((0, 0), (1, 1), (1, 1), (0, 0)))
    taps = [xp[:, 1 + dy:1 + dy + H, 1 + dx:1 + dx + W, :]
            for dy in (-1, 0, 1) for dx in (-1, 0, 1)]
    x9 = jnp.concatenate(taps, axis=-1).reshape(M, 9 * Cin).astype(jnp.float32)
    # Append validity columns that drive the folded first-conv bias.
    x9_aug = jnp.concatenate([x9, prep["valid"]], axis=-1)     # (M, 9*Cin + 9)

    # Single gridless kernel invocation; every operand lives fully in VMEM
    # (total footprint well under 1 MiB on every TPU generation).
    if HW % 8 == 0:
        pooled = pl.pallas_call(
            functools.partial(_pose_trunk_kernel_segpool, bs=bs, hw=HW),
            out_shape=jax.ShapeDtypeStruct((bs, Cout), jnp.float32),
        )(x9_aug, prep["w1_aug"], prep["w2_flat"], prep["b2"],
          prep["w3"], prep["b3"])
    else:
        pooled = pl.pallas_call(
            _pose_trunk_kernel_matpool,
            out_shape=jax.ShapeDtypeStruct((bs, Cout), jnp.float32),
        )(x9_aug, prep["w1_aug"], prep["w2_flat"], prep["b2"],
          prep["pool"], prep["w3"], prep["b3"])

    return pose_from_pooled(pooled)


# --------------------------- pure-JAX reference -------------------------------
def ref_forward(x_nchw, params):
    w1, b1, w2, b2, w3, b3 = (params[k] for k in ("w1", "b1", "w2", "b2", "w3", "b3"))
    Cin, F = w1.shape
    Cout = w3.shape[1]
    dn = ('NCHW', 'OIHW', 'NCHW')
    w1_oihw = w1.T.reshape(F, Cin, 1, 1)
    w2_oihw = jnp.transpose(w2, (2, 1, 0)).reshape(F, F, 3, 3)
    w3_oihw = w3.T.reshape(Cout, F, 1, 1)

    y = lax.conv_general_dilated(x_nchw, w1_oihw, (1, 1), 'VALID',
                                 dimension_numbers=dn)
    y = jnp.maximum(y + b1.reshape(1, F, 1, 1), 0.0)
    y = lax.conv_general_dilated(y, w2_oihw, (1, 1), ((1, 1), (1, 1)),
                                 dimension_numbers=dn)
    y = jnp.maximum(y + b2.reshape(1, F, 1, 1), 0.0)
    y = lax.conv_general_dilated(y, w3_oihw, (1, 1), 'VALID',
                                 dimension_numbers=dn)
    y = y + b3.reshape(1, Cout, 1, 1)
    pooled = jnp.mean(y, axis=(2, 3))
    return pose_from_pooled(pooled)


# ----------------------------------- main -------------------------------------
if __name__ == "__main__":
    bs, num_src, num_in_ch, H, W = 2, 2, 4, 8, 8
    num_fms = 32
    cout = 6 * num_src

    key = jax.random.PRNGKey(0)
    ks = jax.random.split(key, 7)
    params = {
        "w1": jax.random.normal(ks[0], (num_in_ch, num_fms), jnp.float32) * 0.2,
        "b1": jax.random.normal(ks[1], (1, num_fms), jnp.float32) * 0.1,
        "w2": jax.random.normal(ks[2], (9, num_fms, num_fms), jnp.float32) * 0.05,
        "b2": jax.random.normal(ks[3], (1, num_fms), jnp.float32) * 0.1,
        "w3": jax.random.normal(ks[4], (num_fms, cout), jnp.float32) * 0.1,
        "b3": jax.random.normal(ks[5], (1, cout), jnp.float32) * 0.1,
    }
    x_nchw = jax.random.normal(ks[6], (bs, num_in_ch, H, W), jnp.float32)

    # One-time preprocessing, hoisted out of the per-forward path.
    prep = preprocess_pose_decoder_params(params, bs, H, W)

    out = pose_decoder_v2(x_nchw, prep)
    out = jax.block_until_ready(out)
    assert out.shape == (bs * num_src, 4, 4), out.shape

    ref = jax.block_until_ready(ref_forward(x_nchw, params))
    assert jnp.allclose(out, ref, rtol=1e-3, atol=1e-4), (
        "mismatch vs reference: max abs err = %g"
        % float(jnp.max(jnp.abs(out - ref))))

    print("KERNEL_OK")
</pallas_src>

<mosaic_0001>
module attributes {stable_mosaic.version = 11 : i64} {
  func.func @_pose_trunk_kernel_segpool(%arg0: memref<128x45xf32, #tpu.memory_space<vmem>>, %arg1: memref<45x288xf32, #tpu.memory_space<vmem>>, %arg2: memref<288x32xf32, #tpu.memory_space<vmem>>, %arg3: memref<1x32xf32, #tpu.memory_space<vmem>>, %arg4: memref<32x12xf32, #tpu.memory_space<vmem>>, %arg5: memref<1x12xf32, #tpu.memory_space<vmem>>, %arg6: memref<2x12xf32, #tpu.memory_space<vmem>>) attributes {dimension_semantics = [], scalar_prefetch = 0 : i64, scratch_operands = 0 : i64, tpu.core_type = #tpu.core_type<tc>} {
    %c0 = arith.constant 0 : index
    %c0_0 = arith.constant 0 : index
    %0 = vector.load %arg0[%c0, %c0_0] : memref<128x45xf32, #tpu.memory_space<vmem>>, vector<128x45xf32>
    %c0_1 = arith.constant 0 : index
    %c0_2 = arith.constant 0 : index
    %1 = vector.load %arg1[%c0_1, %c0_2] : memref<45x288xf32, #tpu.memory_space<vmem>>, vector<45x288xf32>
    %cst = arith.constant dense<0.000000e+00> : vector<128x288xf32>
    %2 = tpu.matmul %0, %1, %cst {dimension_numbers = #tpu.dot_dimension_numbers<[1], [0], [0], [1], [0, 0, 1, 1], [], []>} : vector<128x45xf32>, vector<45x288xf32>, vector<128x288xf32> -> vector<128x288xf32>
    %cst_3 = arith.constant 0.000000e+00 : f32
    %3 = vector.broadcast %cst_3 : f32 to vector<128x288xf32>
    %4 = arith.maximumf %2, %3 : vector<128x288xf32>
    %c0_4 = arith.constant 0 : index
    %c0_5 = arith.constant 0 : index
    %5 = vector.load %arg2[%c0_4, %c0_5] : memref<288x32xf32, #tpu.memory_space<vmem>>, vector<288x32xf32>
    %cst_6 = arith.constant dense<0.000000e+00> : vector<128x32xf32>
    %6 = tpu.matmul %4, %5, %cst_6 {dimension_numbers = #tpu.dot_dimension_numbers<[1], [0], [0], [1], [0, 0, 1, 1], [], []>} : vector<128x288xf32>, vector<288x32xf32>, vector<128x32xf32> -> vector<128x32xf32>
    %c0_7 = arith.constant 0 : index
    %c0_8 = arith.constant 0 : index
    %7 = vector.load %arg3[%c0_7, %c0_8] : memref<1x32xf32, #tpu.memory_space<vmem>>, vector<1x32xf32>
    %8 = vector.broadcast %7 : vector<1x32xf32> to vector<128x32xf32>
    %9 = arith.addf %6, %8 : vector<128x32xf32>
    %cst_9 = arith.constant 0.000000e+00 : f32
    %10 = vector.broadcast %cst_9 : f32 to vector<128x32xf32>
    %11 = arith.maximumf %9, %10 : vector<128x32xf32>
    %12 = vector.extract_strided_slice %11 {offsets = [0, 0], sizes = [64, 32], strides = [1, 1]} : vector<128x32xf32> to vector<64x32xf32>
    %cst_10 = arith.constant dense<0.000000e+00> : vector<32xf32>
    %13 = vector.multi_reduction <add>, %12, %cst_10 [0] : vector<64x32xf32> to vector<32xf32>
    %14 = vector.shape_cast %13 : vector<32xf32> to vector<1x32xf32>
    %15 = vector.extract_strided_slice %11 {offsets = [64, 0], sizes = [64, 32], strides = [1, 1]} : vector<128x32xf32> to vector<64x32xf32>
    %cst_11 = arith.constant dense<0.000000e+00> : vector<32xf32>
    %16 = vector.multi_reduction <add>, %15, %cst_11 [0] : vector<64x32xf32> to vector<32xf32>
    %17 = vector.shape_cast %16 : vector<32xf32> to vector<1x32xf32>
    %18 = tpu.concatenate %14, %17 in 0 : vector<1x32xf32>, vector<1x32xf32> -> vector<2x32xf32>
    %cst_12 = arith.constant 1.562500e-02 : f32
    %19 = vector.broadcast %cst_12 : f32 to vector<2x32xf32>
    %20 = arith.mulf %18, %19 : vector<2x32xf32>
    %c0_13 = arith.constant 0 : index
    %c0_14 = arith.constant 0 : index
    %21 = vector.load %arg4[%c0_13, %c0_14] : memref<32x12xf32, #tpu.memory_space<vmem>>, vector<32x12xf32>
    %cst_15 = arith.constant dense<0.000000e+00> : vector<2x12xf32>
    %22 = tpu.matmul %20, %21, %cst_15 {dimension_numbers = #tpu.dot_dimension_numbers<[1], [0], [0], [1], [0, 0, 1, 1], [], []>} : vector<2x32xf32>, vector<32x12xf32>, vector<2x12xf32> -> vector<2x12xf32>
    %c0_16 = arith.constant 0 : index
    %c0_17 = arith.constant 0 : index
    %23 = vector.load %arg5[%c0_16, %c0_17] : memref<1x12xf32, #tpu.memory_space<vmem>>, vector<1x12xf32>
    %24 = vector.broadcast %23 : vector<1x12xf32> to vector<2x12xf32>
    %25 = arith.addf %22, %24 : vector<2x12xf32>
    %c0_18 = arith.constant 0 : index
    %c0_19 = arith.constant 0 : index
    %26 = vector.load %arg6[%c0_18, %c0_19] : memref<2x12xf32, #tpu.memory_space<vmem>>, vector<2x12xf32>
    tpu.vector_store %arg6[%c0_18, %c0_19], %25 {strides = array<i32>} : memref<2x12xf32, #tpu.memory_space<vmem>>, vector<2x12xf32>,
    return
  }
}

</mosaic_0001>

<bundles_post_ra>
// kernel: pose_decoder_v2.1
= control target key start
LH: loop header
LB: loop body
LE: loop exit
PB: predicated region body
PF: predicated region fallthrough
CT: control target
= control target key end

     0   :  { %vm106_vm0 = vcmask 1044480   ;;  %vm57_vm1 = vcmask 367616   ;;  %vm399_vm2 = vcmask 261120   ;;  %vm701_vm3 = vcmask 1040384   ;;  %s1283_s1 = inlined_call_operand.vmem [shape: f32[45,288], index: 1, kind: input, shape index: {}]   ;;  %s1284_s0 = inlined_call_operand.vmem [shape: f32[128,45], index: 0, kind: input, shape index: {}]   ;;  %s1285_s2 = inlined_call_operand.vmem [shape: f32[288,32], index: 2, kind: input, shape index: {}]   ;;  %s1286_s3 = inlined_call_operand.vmem [shape: f32[1,32], index: 3, kind: input, shape index: {}]   ;;  %s1287_s4 = inlined_call_operand.vmem [shape: f32[32,12], index: 4, kind: input, shape index: {}]   ;;  %s1288_s5 = inlined_call_operand.vmem [shape: f32[1,12], index: 5, kind: input, shape index: {}]   ;;  %s1289_s6 = inlined_call_operand.vmem [shape: f32[2,12], index: 6, kind: output, shape index: {}]  }
   0x1   :  { %v54_v0 = vld [vmem:[%s1283_s1 + $0x78] sm:$0x1f]  ;;  %v51_v1 = vld [vmem:[%s1283_s1 + $0x60] sm:$0xff]  ;;  %v48_v3 = vld [vmem:[%s1283_s1 + $0x48] sm:$0xff]  ;;  %vm735_vm4 = vcmask 91136  }
   0x2   :  { %741 = vmatpush.msk.msra.mxu0 %vm106_vm0, %v54_v0  ;;  %809 = vmatpush.msk.msra.mxu2 %vm106_vm0, %v54_v0  ;;  %v55_v2 = vld [vmem:[%s1283_s1 + $0x80] sm:$0x1f]  ;;  %v52_v4 = vld [vmem:[%s1283_s1 + $0x68] sm:$0xff]  ;;  %v49_v5 = vld [vmem:[%s1283_s1 + $0x50] sm:$0xff] }
   0x3   :  { %758 = vmatpush.msk.msra.mxu1 %vm106_vm0, %v55_v2  ;;  %815 = vmatpush.msk.msra.mxu3 %vm106_vm0, %v55_v2  ;;  %v45_v6 = vld [vmem:[%s1283_s1 + $0x30] sm:$0xff]  ;;  %v46_v7 = vld [vmem:[%s1283_s1 + $0x38] sm:$0xff]  ;;  %v43_v9 = vld [vmem:[%s1283_s1 + $0x20] sm:$0xff] }
   0x4   :  { %127 = vmatpush.msra.mxu0 %v51_v1  ;;  %810 = vmatpush.msra.mxu2 %v51_v1  ;;  %v42_v8 = vld [vmem:[%s1283_s1 + $0x18] sm:$0xff]  ;;  %v39_v10 = vld [vmem:[%s1283_s1] sm:$0xff]  ;;  %v903_v12 = vld [vmem:[%s1284_s0 + $0x48] sm:$0xff] }
   0x5   :  { %192 = vmatpush.msra.mxu1 %v52_v4  ;;  %816 = vmatpush.msra.mxu3 %v52_v4  ;;  %v898_v11 = vld [vmem:[%s1284_s0] sm:$0xff]  ;;  %v56_v13 = vld [vmem:[%s1283_s1 + $0x88] sm:$0x1f]  ;;  %v53_v15 = vld [vmem:[%s1283_s1 + $0x70] sm:$0xff] }
   0x6   :  { %128 = vmatpush.msra.mxu0 %v48_v3  ;;  %811 = vmatpush.msra.mxu2 %v48_v3  ;;  %v40_v14 = vld [vmem:[%s1283_s1 + $0x8] sm:$0xff]  ;;  %v50_v16 = vld [vmem:[%s1283_s1 + $0x58] sm:$0xff]  ;;  %v47_v17 = vld [vmem:[%s1283_s1 + $0x40] sm:$0xff] }
   0x7   :  { %193 = vmatpush.msra.mxu1 %v49_v5  ;;  %817 = vmatpush.msra.mxu3 %v49_v5  ;;  %v24_v18 = vld [vmem:[%s1284_s0 + $0x8] sm:$0xff]  ;;  %v935_v19 = vld [vmem:[%s1284_s0 + $0x50] sm:$0xff]  ;;  %v955_v23 = vld [vmem:[%s1284_s0 + $0x58] sm:$0xff] }
   0x8   :  { %129 = vmatpush.msra.mxu0 %v45_v6  ;;  %812 = vmatpush.msra.mxu2 %v45_v6  ;;  %v44_v20 = vld [vmem:[%s1283_s1 + $0x28] sm:$0xff]  ;;  %v41_v21 = vld [vmem:[%s1283_s1 + $0x10] sm:$0xff]  ;;  %v26_v24 = vld [vmem:[%s1284_s0 + $0x18] sm:$0xff] }
   0x9   :  { %194 = vmatpush.msra.mxu1 %v46_v7  ;;  %818 = vmatpush.msra.mxu3 %v46_v7  ;;  %v25_v22 = vld [vmem:[%s1284_s0 + $0x10] sm:$0xff]  ;;  %v969_v25 = vld [vmem:[%s1284_s0 + $0x60] sm:$0xff]  ;;  %v985_v27 = vld [vmem:[%s1284_s0 + $0x68] sm:$0xff] }
   0xa   :  { %130 = vmatpush.msra.mxu0 %v42_v8  ;;  %813 = vmatpush.msra.mxu2 %v42_v8  ;;  %v980_v26 = vld [vmem:[%s1284_s0 + $0x20] sm:$0xff]  ;;  %v998_v28 = vld [vmem:[%s1284_s0 + $0x28] sm:$0xff]  ;;  %v1003_v29 = vld [vmem:[%s1284_s0 + $0x70] sm:$0xff] }
   0xb   :  { %195 = vmatpush.msra.mxu1 %v43_v9  ;;  %819 = vmatpush.msra.mxu3 %v43_v9  ;;  %v1016_v30 = vld [vmem:[%s1284_s0 + $0x30] sm:$0xff]  ;;  %v1021_v31 = vld [vmem:[%s1284_s0 + $0x78] sm:$0xff]  ;;  %v1045_v33 = vld [vmem:[%s1284_s0 + $0x40] sm:$0xff] }
   0xc   :  { %131 = vmatpush.msra.mxu0 %v39_v10  ;;  %814 = vmatpush.msra.mxu2 %v39_v10  ;;  %v1034_v32 = vld [vmem:[%s1284_s0 + $0x38] sm:$0xff]  ;;  %v373_v35 = vld [vmem:[%s1285_s2 + $0x70] sm:$0xff]  ;;  %v372_v36 = vld [vmem:[%s1285_s2 + $0x68] sm:$0xff] }
   0xd   :  { %742 = vmatmul.msk.f32.vlgmr.msra.gmra.mxu0 %vm57_vm1, %v898_v11  ;;  %751 = vmatmul.msk.f32.vlgmr.msra.gmra.mxu2 %vm57_vm1, %v903_v12  ;;  %v374_v34 = vld [vmem:[%s1285_s2 + $0x78] sm:$0xff]  ;;  %v371_v37 = vld [vmem:[%s1285_s2 + $0x60] sm:$0xff]  ;;  %v369_v40 = vld [vmem:[%s1285_s2 + $0x50] sm:$0xff] }
   0xe   :  { %775 = vmatpush.msk.msrb.mxu2 %vm106_vm0, %v56_v13  ;;  %196 = vmatpush.msra.mxu1 %v40_v14  ;;  %v370_v38 = vld [vmem:[%s1285_s2 + $0x58] sm:$0xff]  ;;  %v389_v41 = vld [vmem:[%s1285_s2 + $0xf0] sm:$0xff]  ;;  %v368_v42 = vld [vmem:[%s1285_s2 + $0x48] sm:$0xff] }
   0xf   :  { %759 = vmatmul.msk.f32.vlgmr.msra.gmra.mxu1 %vm57_vm1, %v898_v11  ;;  %820 = vmatpush.msra.mxu3 %v40_v14  ;;  %v390_v39 = vld [vmem:[%s1285_s2 + $0xf8] sm:$0xff]  ;;  %v388_v43 = vld [vmem:[%s1285_s2 + $0xe8] sm:$0xff]  ;;  %v367_v44 = vld [vmem:[%s1285_s2 + $0x40] sm:$0xff] }
  0x10   :  { %257 = vmatpush.msrb.mxu2 %v53_v15  ;;  %768 = vmatmul.msk.f32.vlgmr.msra.gmra.mxu3 %vm57_vm1, %v903_v12  ;;  %v387_v45 = vld [vmem:[%s1285_s2 + $0xe0] sm:$0xff]  ;;  %v366_v46 = vld [vmem:[%s1285_s2 + $0x38] sm:$0xff]  ;;  %v365_v48 = vld [vmem:[%s1285_s2 + $0x30] sm:$0xff] }
  0x11   :  { %448 = vmatpush.msrb.mxu3 %v374_v34  ;;  %513 = vmatpush.msrb.mxu0 %v390_v39  ;;  %v386_v47 = vld [vmem:[%s1285_s2 + $0xd8] sm:$0xff]  ;;  %v385_v49 = vld [vmem:[%s1285_s2 + $0xd0] sm:$0xff]  ;;  %v364_v50 = vld [vmem:[%s1285_s2 + $0x28] sm:$0xff] }
  0x12   :  { %258 = vmatpush.msrb.mxu2 %v50_v16  ;;  %v384_v51 = vld [vmem:[%s1285_s2 + $0xc8] sm:$0xff]  ;;  %v394_v52 = vld [vmem:[%s1285_s2 + $0x118] sm:$0xff]  ;;  %v363_v53 = vld [vmem:[%s1285_s2 + $0x20] sm:$0xff] }
  0x13   :  { %449 = vmatpush.msrb.mxu3 %v373_v35  ;;  %514 = vmatpush.msrb.mxu0 %v389_v41  ;;  %v383_v54 = vld [vmem:[%s1285_s2 + $0xc0] sm:$0xff]  ;;  %v362_v55 = vld [vmem:[%s1285_s2 + $0x18] sm:$0xff]  ;;  %v361_v57 = vld [vmem:[%s1285_s2 + $0x10] sm:$0xff] }
  0x14   :  { %259 = vmatpush.msrb.mxu2 %v47_v17  ;;  %590 = vmatpush.msrb.mxu1 %v394_v52  ;;  %v382_v56 = vld [vmem:[%s1285_s2 + $0xb8] sm:$0xff]  ;;  %v381_v58 = vld [vmem:[%s1285_s2 + $0xb0] sm:$0xff]  ;;  %v360_v59 = vld [vmem:[%s1285_s2 + $0x8] sm:$0xff] }
  0x15   :  { %743 = vmatmul.msk.f32.gmra.mxu0 %vm57_vm1, %v24_v18  ;;  %752 = vmatmul.msk.f32.gmra.mxu2 %vm57_vm1, %v935_v19  ;;  %v380_v60 = vld [vmem:[%s1285_s2 + $0xa8] sm:$0xff]  ;;  %v359_v61 = vld [vmem:[%s1285_s2] sm:$0xff]  ;;  %v378_v63 = vld [vmem:[%s1285_s2 + $0x98] sm:$0xff] }
  0x16   :  { %260 = vmatpush.msrb.mxu2 %v44_v20  ;;  %450 = vmatpush.msrb.mxu3 %v372_v36  ;;  %v379_v62 = vld [vmem:[%s1285_s2 + $0xa0] sm:$0xff]  ;;  %v377_v0 = vld [vmem:[%s1285_s2 + $0x90] sm:$0xff]  ;;  %v376_v1 = vld [vmem:[%s1285_s2 + $0x88] sm:$0xff] }
  0x17   :  { %760 = vmatmul.msk.f32.gmra.mxu1 %vm57_vm1, %v24_v18  ;;  %515 = vmatpush.msrb.mxu0 %v388_v43  ;;  %v375_v2 = vld [vmem:[%s1285_s2 + $0x80] sm:$0xff]  ;;  %v393_v3 = vld [vmem:[%s1285_s2 + $0x110] sm:$0xff]  ;;  %v392_v4 = vld [vmem:[%s1285_s2 + $0x108] sm:$0xff] }
  0x18   :  { %261 = vmatpush.msrb.mxu2 %v41_v21  ;;  %769 = vmatmul.msk.f32.gmra.mxu3 %vm57_vm1, %v935_v19 }
  0x19   :  { %451 = vmatpush.msrb.mxu3 %v371_v37  ;;  %516 = vmatpush.msrb.mxu0 %v387_v45 }
  0x1a   :  { %591 = vmatpush.msrb.mxu1 %v393_v3 }
  0x1b   :  { %452 = vmatpush.msrb.mxu3 %v370_v38  ;;  %517 = vmatpush.msrb.mxu0 %v386_v47 }
  0x1c   :  { %592 = vmatpush.msrb.mxu1 %v392_v4 }
  0x1d   :  { %744 = vmatmul.msk.f32.gmra.mxu0 %vm57_vm1, %v25_v22  ;;  %753 = vmatmul.msk.f32.gmra.mxu2 %vm57_vm1, %v955_v23 }
  0x1e   :  { %453 = vmatpush.msrb.mxu3 %v369_v40  ;;  %518 = vmatpush.msrb.mxu0 %v385_v49 }
  0x1f   :  { %761 = vmatmul.msk.f32.gmra.mxu1 %vm57_vm1, %v25_v22 }
  0x20   :  { %770 = vmatmul.msk.f32.gmra.mxu3 %vm57_vm1, %v955_v23  ;;  %519 = vmatpush.msrb.mxu0 %v384_v51 }
  0x21   :  { %454 = vmatpush.msrb.mxu3 %v368_v42 }
  0x22   :  { %520 = vmatpush.msrb.mxu0 %v383_v54 }
  0x23   :  { %455 = vmatpush.msrb.mxu3 %v367_v44 }
  0x24   :  { %521 = vmatpush.msrb.mxu0 %v382_v56 }
  0x25   :  { %745 = vmatmul.msk.f32.gmra.mxu0 %vm57_vm1, %v26_v24  ;;  %754 = vmatmul.msk.f32.gmra.mxu2 %vm57_vm1, %v969_v25 }
  0x26   :  { %456 = vmatpush.msrb.mxu3 %v366_v46  ;;  %522 = vmatpush.msrb.mxu0 %v381_v58 }
  0x27   :  { %762 = vmatmul.msk.f32.gmra.mxu1 %vm57_vm1, %v26_v24 }
  0x28   :  { %771 = vmatmul.msk.f32.gmra.mxu3 %vm57_vm1, %v969_v25  ;;  %523 = vmatpush.msrb.mxu0 %v380_v60 }
  0x29   :  { %457 = vmatpush.msrb.mxu3 %v365_v48 }
  0x2a   :  { %524 = vmatpush.msrb.mxu0 %v379_v62 }
  0x2b   :  { %458 = vmatpush.msrb.mxu3 %v364_v50 }
  0x2c   :  { %525 = vmatpush.msrb.mxu0 %v378_v63 }
  0x2d   :  { %746 = vmatmul.msk.f32.gmra.mxu0 %vm57_vm1, %v980_v26  ;;  %755 = vmatmul.msk.f32.gmra.mxu2 %vm57_vm1, %v985_v27 }
  0x2e   :  { %459 = vmatpush.msrb.mxu3 %v363_v53  ;;  %526 = vmatpush.msrb.mxu0 %v377_v0 }
  0x2f   :  { %763 = vmatmul.msk.f32.gmra.mxu1 %vm57_vm1, %v980_v26 }
  0x30   :  { %772 = vmatmul.msk.f32.gmra.mxu3 %vm57_vm1, %v985_v27  ;;  %527 = vmatpush.msrb.mxu0 %v376_v1 }
  0x31   :  { %460 = vmatpush.msrb.mxu3 %v362_v55 }
  0x32   :  { %528 = vmatpush.msrb.mxu0 %v375_v2 }
  0x33   :  { %461 = vmatpush.msrb.mxu3 %v361_v57 }
  0x35   :  { %747 = vmatmul.msk.f32.gmra.mxu0 %vm57_vm1, %v998_v28  ;;  %756 = vmatmul.msk.f32.gmra.mxu2 %vm57_vm1, %v1003_v29 }
  0x36   :  { %462 = vmatpush.msrb.mxu3 %v360_v59 }
  0x37   :  { %764 = vmatmul.msk.f32.gmra.mxu1 %vm57_vm1, %v998_v28 }
  0x38   :  { %773 = vmatmul.msk.f32.gmra.mxu3 %vm57_vm1, %v1003_v29 }
  0x39   :  { %463 = vmatpush.msrb.mxu3 %v359_v61 }
  0x3d   :  { %748 = vmatmul.msk.f32.gmra.mxu0 %vm57_vm1, %v1016_v30  ;;  %757 = vmatmul.msk.f32.gmra.mxu2 %vm57_vm1, %v1021_v31 }
  0x3f   :  { %765 = vmatmul.msk.f32.gmra.mxu1 %vm57_vm1, %v1016_v30 }
  0x40   :  { %774 = vmatmul.msk.f32.gmra.mxu3 %vm57_vm1, %v1021_v31 }
  0x45   :  { %749 = vmatmul.msk.f32.gmra.mxu0 %vm57_vm1, %v1034_v32  ;;  %776 = vmatmul.msk.f32.vlgmr.msrb.gmra.mxu2 %vm57_vm1, %v898_v11 }
  0x47   :  { %766 = vmatmul.msk.f32.gmra.mxu1 %vm57_vm1, %v1034_v32 }
  0x4d   :  { %750 = vmatmul.msk.f32.gmra.mxu0 %vm57_vm1, %v1045_v33  ;;  %777 = vmatmul.msk.f32.gmra.mxu2 %vm57_vm1, %v24_v18 }
  0x4f   :  { %767 = vmatmul.msk.f32.gmra.mxu1 %vm57_vm1, %v1045_v33 }
  0x55   :  { %778 = vmatmul.msk.f32.gmra.mxu2 %vm57_vm1, %v25_v22 }
  0x5d   :  { %779 = vmatmul.msk.f32.gmra.mxu2 %vm57_vm1, %v26_v24 }
  0x65   :  { %780 = vmatmul.msk.f32.gmra.mxu2 %vm57_vm1, %v980_v26 }
  0x6d   :  { %781 = vmatmul.msk.f32.gmra.mxu2 %vm57_vm1, %v998_v28 }
  0x75   :  { %782 = vmatmul.msk.f32.gmra.mxu2 %vm57_vm1, %v1016_v30 }
  0x7d   :  { %783 = vmatmul.msk.f32.gmra.mxu2 %vm57_vm1, %v1034_v32 }
  0x85   :  { %784 = vmatmul.msk.f32.gmra.mxu2 %vm57_vm1, %v1045_v33 }
  0x8a   :  { %v133_v5 = vpop.f32.mrf.mxu0 }
  0x8b   :  { %v311_v6 = vmax.f32 %v133_v5, 0.0 }
  0x8c   :  { %v198_v7 = vpop.f32.mrf.mxu1 }
  0x8d   :  { %785 = vmatmul.msk.f32.gmra.mxu2 %vm57_vm1, %v903_v12  ;;  %464 = vmatmul.f32.vlgmr.msrb.gmra.mxu3 %v311_v6  ;;  %v312_v8 = vmax.f32 %v198_v7, 0.0  ;;  %v391_v12 = vld [vmem:[%s1285_s2 + $0x100] sm:$0xff] }
  0x8e   :  { %593 = vmatpush.msrb.mxu1 %v391_v12 }
  0x8f   :  { %529 = vmatmul.f32.vlgmr.msrb.gmra.mxu0 %v312_v8 }
  0x90   :  { %v1171_v9 = vpop.f32.mrf.mxu2 }
  0x91   :  { %v338_v55 = vmax.f32 %v1171_v9, 0.0 }
  0x92   :  { %v136_v10 = vpop.f32.mrf.mxu0 }
  0x93   :  { %v314_v11 = vmax.f32 %v136_v10, 0.0  ;;  %v225_v46 = vpop.f32.mrf.mxu3 }
  0x94   :  { %v201_v13 = vpop.f32.mrf.mxu1  ;;  %v339_v56 = vmax.f32 %v225_v46, 0.0 }
  0x95   :  { %786 = vmatmul.msk.f32.gmra.mxu2 %vm57_vm1, %v935_v19  ;;  %467 = vmatmul.f32.gmra.mxu3 %v314_v11  ;;  %v315_v14 = vmax.f32 %v201_v13, 0.0 }
  0x97   :  { %532 = vmatmul.f32.gmra.mxu0 %v315_v14 }
  0x98   :  { %v1175_v15 = vpop.f32.mrf.mxu2 }
  0x99   :  { %v341_v60 = vmax.f32 %v1175_v15, 0.0 }
  0x9a   :  { %v139_v16 = vpop.f32.mrf.mxu0 }
  0x9b   :  { %v317_v17 = vmax.f32 %v139_v16, 0.0  ;;  %v228_v53 = vpop.f32.mrf.mxu3 }
  0x9c   :  { %v204_v18 = vpop.f32.mrf.mxu1  ;;  %v342_v61 = vmax.f32 %v228_v53, 0.0 }
  0x9d   :  { %787 = vmatmul.msk.f32.gmra.mxu2 %vm57_vm1, %v955_v23  ;;  %470 = vmatmul.f32.gmra.mxu3 %v317_v17  ;;  %v318_v20 = vmax.f32 %v204_v18, 0.0 }
  0x9f   :  { %535 = vmatmul.f32.gmra.mxu0 %v318_v20 }
  0xa0   :  { %v1182_v19 = vpop.f32.mrf.mxu2 }
  0xa1   :  { %v344_v0 = vmax.f32 %v1182_v19, 0.0 }
  0xa2   :  { %v142_v21 = vpop.f32.mrf.mxu0 }
  0xa3   :  { %v320_v22 = vmax.f32 %v142_v21, 0.0  ;;  %v231_v59 = vpop.f32.mrf.mxu3 }
  0xa4   :  { %v207_v24 = vpop.f32.mrf.mxu1  ;;  %v345_v1 = vmax.f32 %v231_v59, 0.0 }
  0xa5   :  { %788 = vmatmul.msk.f32.gmra.mxu2 %vm57_vm1, %v969_v25  ;;  %473 = vmatmul.f32.gmra.mxu3 %v320_v22  ;;  %v321_v26 = vmax.f32 %v207_v24, 0.0 }
  0xa7   :  { %538 = vmatmul.f32.gmra.mxu0 %v321_v26 }
  0xa8   :  { %v1186_v28 = vpop.f32.mrf.mxu2 }
  0xa9   :  { %v347_v5 = vmax.f32 %v1186_v28, 0.0  ;;  %v1219_v28 = vld [vmem:[%s1286_s3] ss:$0 sm:$0xff] }
  0xaa   :  { %v145_v30 = vpop.f32.mrf.mxu0 }
  0xab   :  { %v323_v32 = vmax.f32 %v145_v30, 0.0  ;;  %v234_v2 = vpop.f32.mrf.mxu3 }
  0xac   :  { %v210_v33 = vpop.f32.mrf.mxu1  ;;  %v348_v6 = vmax.f32 %v234_v2, 0.0 }
  0xad   :  { %789 = vmatmul.msk.f32.gmra.mxu2 %vm57_vm1, %v985_v27  ;;  %476 = vmatmul.f32.gmra.mxu3 %v323_v32  ;;  %v324_v23 = vmax.f32 %v210_v33, 0.0 }
  0xaf   :  { %541 = vmatmul.f32.gmra.mxu0 %v324_v23 }
  0xb0   :  { %v1190_v34 = vpop.f32.mrf.mxu2 }
  0xb1   :  { %v350_v10 = vmax.f32 %v1190_v34, 0.0 }
  0xb2   :  { %v148_v35 = vpop.f32.mrf.mxu0 }
  0xb3   :  { %v326_v36 = vmax.f32 %v148_v35, 0.0  ;;  %v237_v7 = vpop.f32.mrf.mxu3 }
  0xb4   :  { %v213_v37 = vpop.f32.mrf.mxu1  ;;  %v351_v11 = vmax.f32 %v237_v7, 0.0 }
  0xb5   :  { %790 = vmatmul.msk.f32.gmra.mxu2 %vm57_vm1, %v1003_v29  ;;  %479 = vmatmul.f32.gmra.mxu3 %v326_v36  ;;  %v327_v25 = vmax.f32 %v213_v37, 0.0 }
  0xb7   :  { %544 = vmatmul.f32.gmra.mxu0 %v327_v25 }
  0xb8   :  { %v1194_v38 = vpop.f32.mrf.mxu2 }
  0xb9   :  { %v353_v12 = vmax.f32 %v1194_v38, 0.0 }
  0xba   :  { %v151_v39 = vpop.f32.mrf.mxu0 }
  0xbb   :  { %v329_v40 = vmax.f32 %v151_v39, 0.0  ;;  %v240_v14 = vpop.f32.mrf.mxu3 }
  0xbc   :  { %v216_v41 = vpop.f32.mrf.mxu1  ;;  %v354_v16 = vmax.f32 %v240_v14, 0.0 }
  0xbd   :  { %791 = vmatmul.msk.f32.gmra.mxu2 %vm57_vm1, %v1021_v31  ;;  %482 = vmatmul.f32.gmra.mxu3 %v329_v40  ;;  %v330_v27 = vmax.f32 %v216_v41, 0.0 }
  0xbf   :  { %547 = vmatmul.f32.gmra.mxu0 %v330_v27 }
  0xc0   :  { %v1198_v42 = vpop.f32.mrf.mxu2 }
  0xc1   :  { %v356_v19 = vmax.f32 %v1198_v42, 0.0 }
  0xc2   :  { %v154_v43 = vpop.f32.mrf.mxu0 }
  0xc3   :  { %v332_v44 = vmax.f32 %v154_v43, 0.0  ;;  %v243_v20 = vpop.f32.mrf.mxu3 }
  0xc4   :  { %v219_v45 = vpop.f32.mrf.mxu1  ;;  %v357_v21 = vmax.f32 %v243_v20, 0.0 }
  0xc5   :  { %485 = vmatmul.f32.gmra.mxu3 %v332_v44  ;;  %v333_v29 = vmax.f32 %v219_v45, 0.0 }
  0xc7   :  { %550 = vmatmul.f32.gmra.mxu0 %v333_v29 }
  0xc8   :  { %v263_v47 = vpop.f32.mrf.mxu2 }
  0xc9   :  { %v313_v48 = vmax.f32 %v263_v47, 0.0 }
  0xca   :  { %v157_v49 = vpop.f32.mrf.mxu0 }
  0xcb   :  { %v335_v50 = vmax.f32 %v157_v49, 0.0  ;;  %792 = vmatmul.msk.f32.vlgmr.msrb.gmra.mxu1 %vm399_vm2, %v313_v48 }
  0xcc   :  { %v222_v31 = vpop.f32.mrf.mxu1 }
  0xcd   :  { %488 = vmatmul.f32.gmra.mxu3 %v335_v50  ;;  %v336_v51 = vmax.f32 %v222_v31, 0.0 }
  0xcf   :  { %553 = vmatmul.f32.gmra.mxu0 %v336_v51 }
  0xd0   :  { %v266_v52 = vpop.f32.mrf.mxu2 }
  0xd1   :  { %v316_v54 = vmax.f32 %v266_v52, 0.0 }
  0xd3   :  { %793 = vmatmul.msk.f32.gmra.mxu1 %vm399_vm2, %v316_v54 }
  0xd5   :  { %491 = vmatmul.f32.gmra.mxu3 %v338_v55 }
  0xd7   :  { %556 = vmatmul.f32.gmra.mxu0 %v339_v56  ;;  %v707_v56 = vld [vmem:[%s1287_s4 + $0x18] sm:$0xff] }
  0xd8   :  { %v269_v57 = vpop.f32.mrf.mxu2  ;;  %727 = vmatpush.msra.mxu2 %v707_v56 }
  0xd9   :  { %v319_v58 = vmax.f32 %v269_v57, 0.0 }
  0xdb   :  { %794 = vmatmul.msk.f32.gmra.mxu1 %vm399_vm2, %v319_v58 }
  0xdd   :  { %494 = vmatmul.f32.gmra.mxu3 %v341_v60 }
  0xdf   :  { %559 = vmatmul.f32.gmra.mxu0 %v342_v61 }
  0xe0   :  { %v272_v62 = vpop.f32.mrf.mxu2 }
  0xe1   :  { %v322_v63 = vmax.f32 %v272_v62, 0.0 }
  0xe3   :  { %795 = vmatmul.msk.f32.gmra.mxu1 %vm399_vm2, %v322_v63 }
  0xe5   :  { %497 = vmatmul.f32.gmra.mxu3 %v344_v0 }
  0xe7   :  { %562 = vmatmul.f32.gmra.mxu0 %v345_v1 }
  0xe8   :  { %v275_v3 = vpop.f32.mrf.mxu2 }
  0xe9   :  { %v325_v4 = vmax.f32 %v275_v3, 0.0 }
  0xeb   :  { %796 = vmatmul.msk.f32.gmra.mxu1 %vm399_vm2, %v325_v4 }
  0xed   :  { %500 = vmatmul.f32.gmra.mxu3 %v347_v5 }
  0xef   :  { %565 = vmatmul.f32.gmra.mxu0 %v348_v6 }
  0xf0   :  { %v278_v8 = vpop.f32.mrf.mxu2 }
  0xf1   :  { %v328_v9 = vmax.f32 %v278_v8, 0.0 }
  0xf3   :  { %797 = vmatmul.msk.f32.gmra.mxu1 %vm399_vm2, %v328_v9 }
  0xf5   :  { %503 = vmatmul.f32.gmra.mxu3 %v350_v10 }
  0xf7   :  { %568 = vmatmul.f32.gmra.mxu0 %v351_v11 }
  0xf8   :  { %v281_v13 = vpop.f32.mrf.mxu2 }
  0xf9   :  { %v331_v15 = vmax.f32 %v281_v13, 0.0 }
  0xfb   :  { %798 = vmatmul.msk.f32.gmra.mxu1 %vm399_vm2, %v331_v15 }
  0xfd   :  { %506 = vmatmul.f32.gmra.mxu3 %v353_v12 }
  0xff   :  { %571 = vmatmul.f32.gmra.mxu0 %v354_v16 }
 0x100   :  { %v284_v17 = vpop.f32.mrf.mxu2 }
 0x101   :  { %v334_v18 = vmax.f32 %v284_v17, 0.0  ;;  %v706_v17 = vld [vmem:[%s1287_s4 + $0x10] sm:$0xff] }
 0x102   :  { %728 = vmatpush.msra.mxu2 %v706_v17 }
 0x103   :  { %799 = vmatmul.msk.f32.gmra.mxu1 %vm399_vm2, %v334_v18 }
 0x105   :  { %509 = vmatmul.f32.gmra.mxu3 %v356_v19 }
 0x107   :  { %574 = vmatmul.f32.gmra.mxu0 %v357_v21 }
 0x108   :  { %v287_v22 = vpop.f32.mrf.mxu2 }
 0x109   :  { %v337_v24 = vmax.f32 %v287_v22, 0.0 }
 0x10b   :  { %800 = vmatmul.msk.f32.gmra.mxu1 %vm399_vm2, %v337_v24 }
 0x10c   :  { %v530_v26 = vpop.f32.mrf.mxu0 }
 0x110   :  { %v290_v30 = vpop.f32.mrf.mxu2  ;;  %v465_v32 = vpop.f32.mrf.mxu3 }
 0x111   :  { %v340_v33 = vmax.f32 %v290_v30, 0.0  ;;  %v466_v23 = vadd.f32 %v1219_v28, %v465_v32 }
 0x113   :  { %v531_v34 = vadd.f32 %v530_v26, %v466_v23  ;;  %801 = vmatmul.msk.f32.gmra.mxu1 %vm399_vm2, %v340_v33 }
 0x114   :  { %v533_v35 = vpop.f32.mrf.mxu0 }
 0x118   :  { %v293_v36 = vpop.f32.mrf.mxu2  ;;  %v468_v37 = vpop.f32.mrf.mxu3 }
 0x119   :  { %v343_v25 = vmax.f32 %v293_v36, 0.0  ;;  %v469_v38 = vadd.f32 %v1219_v28, %v468_v37 }
 0x11b   :  { %v534_v39 = vadd.f32 %v533_v35, %v469_v38  ;;  %802 = vmatmul.msk.f32.gmra.mxu1 %vm399_vm2, %v343_v25 }
 0x11c   :  { %v536_v40 = vpop.f32.mrf.mxu0 }
 0x120   :  { %v296_v41 = vpop.f32.mrf.mxu2  ;;  %v471_v27 = vpop.f32.mrf.mxu3 }
 0x121   :  { %v346_v42 = vmax.f32 %v296_v41, 0.0  ;;  %v472_v43 = vadd.f32 %v1219_v28, %v471_v27 }
 0x123   :  { %v537_v44 = vadd.f32 %v536_v40, %v472_v43  ;;  %803 = vmatmul.msk.f32.gmra.mxu1 %vm399_vm2, %v346_v42  ;;  %v705_v43 = vld [vmem:[%s1287_s4 + $0x8] sm:$0xff] }
 0x124   :  { %v539_v45 = vpop.f32.mrf.mxu0  ;;  %729 = vmatpush.msra.mxu2 %v705_v43 }
 0x128   :  { %v299_v29 = vpop.f32.mrf.mxu2  ;;  %v474_v46 = vpop.f32.mrf.mxu3 }
 0x129   :  { %v349_v47 = vmax.f32 %v299_v29, 0.0  ;;  %v475_v48 = vadd.f32 %v1219_v28, %v474_v46 }
 0x12b   :  { %v540_v49 = vadd.f32 %v539_v45, %v475_v48  ;;  %804 = vmatmul.msk.f32.gmra.mxu1 %vm399_vm2, %v349_v47 }
 0x12c   :  { %v542_v50 = vpop.f32.mrf.mxu0 }
 0x130   :  { %v302_v31 = vpop.f32.mrf.mxu2  ;;  %v477_v51 = vpop.f32.mrf.mxu3 }
 0x131   :  { %v352_v52 = vmax.f32 %v302_v31, 0.0  ;;  %v478_v53 = vadd.f32 %v1219_v28, %v477_v51 }
 0x133   :  { %v543_v54 = vadd.f32 %v542_v50, %v478_v53  ;;  %805 = vmatmul.msk.f32.gmra.mxu1 %vm399_vm2, %v352_v52 }
 0x134   :  { %v545_v55 = vpop.f32.mrf.mxu0 }
 0x138   :  { %v305_v57 = vpop.f32.mrf.mxu2  ;;  %v480_v58 = vpop.f32.mrf.mxu3 }
 0x139   :  { %v355_v59 = vmax.f32 %v305_v57, 0.0  ;;  %v481_v60 = vadd.f32 %v1219_v28, %v480_v58 }
 0x13b   :  { %v546_v61 = vadd.f32 %v545_v55, %v481_v60  ;;  %806 = vmatmul.msk.f32.gmra.mxu1 %vm399_vm2, %v355_v59  ;;  %v704_v60 = vld [vmem:[%s1287_s4] sm:$0xff] }
 0x13c   :  { %v548_v62 = vpop.f32.mrf.mxu0  ;;  %730 = vmatpush.msra.mxu2 %v704_v60 }
 0x140   :  { %v308_v63 = vpop.f32.mrf.mxu2  ;;  %v483_v0 = vpop.f32.mrf.mxu3 }
 0x141   :  { %v358_v1 = vmax.f32 %v308_v63, 0.0  ;;  %v484_v2 = vadd.f32 %v1219_v28, %v483_v0 }
 0x143   :  { %v549_v3 = vadd.f32 %v548_v62, %v484_v2  ;;  %807 = vmatmul.msk.f32.gmra.mxu1 %vm399_vm2, %v358_v1 }
 0x144   :  { %v551_v8 = vpop.f32.mrf.mxu0 }
 0x148   :  { %v486_v4 = vpop.f32.mrf.mxu3  ;;  %v595_v5 = vpop.f32.mrf.mxu1 }
 0x149   :  { %v487_v6 = vadd.f32 %v1219_v28, %v486_v4  ;;  %v596_v7 = vadd.f32 %v595_v5, %v531_v34 }
 0x14b   :  { %v552_v9 = vadd.f32 %v551_v8, %v487_v6  ;;  %v643_v11 = vmax.f32 %v596_v7, 0.0 }
 0x14c   :  { %v554_v27 = vpop.f32.mrf.mxu0 }
 0x14d   :  { %v659_v15 = vsel %vm399_vm2, %v643_v11, 0.0 }
 0x150   :  { %v598_v10 = vpop.f32.mrf.mxu1 }
 0x151   :  { %v599_v13 = vadd.f32 %v598_v10, %v534_v39  ;;  %v489_v39 = vpop.f32.mrf.mxu3 }
 0x152   :  { %v490_v4 = vadd.f32 %v1219_v28, %v489_v39 }
 0x153   :  { %v644_v14 = vmax.f32 %v599_v13, 0.0 }
 0x154   :  { %v555_v7 = vadd.f32 %v554_v27, %v490_v4 }
 0x155   :  { %v660_v12 = vsel %vm399_vm2, %v644_v14, 0.0 }
 0x156   :  { %v661_v16 = vadd.f32 %v660_v12, %v659_v15 }
 0x158   :  { %v601_v18 = vpop.f32.mrf.mxu1 }
 0x159   :  { %v602_v20 = vadd.f32 %v601_v18, %v537_v44  ;;  %v492_v46 = vpop.f32.mrf.mxu3 }
 0x15a   :  { %v493_v5 = vadd.f32 %v1219_v28, %v492_v46 }
 0x15b   :  { %v645_v19 = vmax.f32 %v602_v20, 0.0 }
 0x15d   :  { %v662_v21 = vsel %vm399_vm2, %v645_v19, 0.0 }
 0x15e   :  { %v663_v22 = vadd.f32 %v662_v21, %v661_v16 }
 0x160   :  { %v604_v24 = vpop.f32.mrf.mxu1 }
 0x161   :  { %v605_v26 = vadd.f32 %v604_v24, %v540_v49  ;;  %v557_v49 = vpop.f32.mrf.mxu0  ;;  %v495_v53 = vpop.f32.mrf.mxu3 }
 0x162   :  { %v496_v6 = vadd.f32 %v1219_v28, %v495_v53  ;;  %v558_v8 = vadd.f32 %v557_v49, %v493_v5 }
 0x163   :  { %v646_v30 = vmax.f32 %v605_v26, 0.0 }
 0x165   :  { %v664_v32 = vsel %vm399_vm2, %v646_v30, 0.0 }
 0x166   :  { %v665_v33 = vadd.f32 %v664_v32, %v663_v22 }
 0x168   :  { %v607_v23 = vpop.f32.mrf.mxu1 }
 0x169   :  { %v608_v34 = vadd.f32 %v607_v23, %v543_v54  ;;  %v560_v56 = vpop.f32.mrf.mxu0  ;;  %v498_v57 = vpop.f32.mrf.mxu3 }
 0x16a   :  { %v561_v11 = vadd.f32 %v560_v56, %v496_v6 }
 0x16b   :  { %v647_v35 = vmax.f32 %v608_v34, 0.0 }
 0x16d   :  { %v666_v36 = vsel %vm399_vm2, %v647_v35, 0.0 }
 0x16e   :  { %v667_v37 = vadd.f32 %v666_v36, %v665_v33 }
 0x170   :  { %v610_v25 = vpop.f32.mrf.mxu1 }
 0x171   :  { %v611_v38 = vadd.f32 %v610_v25, %v546_v61  ;;  %v563_v59 = vpop.f32.mrf.mxu0  ;;  %v501_v62 = vpop.f32.mrf.mxu3 }
 0x172   :  { %v502_v13 = vadd.f32 %v1219_v28, %v501_v62 }
 0x173   :  { %v648_v40 = vmax.f32 %v611_v38, 0.0 }
 0x175   :  { %v668_v41 = vsel %vm399_vm2, %v648_v40, 0.0 }
 0x176   :  { %v669_v42 = vadd.f32 %v668_v41, %v667_v37 }
 0x178   :  { %v613_v44 = vpop.f32.mrf.mxu1 }
 0x179   :  { %v614_v45 = vadd.f32 %v613_v44, %v549_v3  ;;  %v566_v63 = vpop.f32.mrf.mxu0  ;;  %v504_v1 = vpop.f32.mrf.mxu3 }
 0x17a   :  { %v505_v16 = vadd.f32 %v1219_v28, %v504_v1  ;;  %v567_v19 = vadd.f32 %v566_v63, %v502_v13 }
 0x17b   :  { %v649_v29 = vmax.f32 %v614_v45, 0.0 }
 0x17d   :  { %v670_v47 = vsel %vm399_vm2, %v649_v29, 0.0 }
 0x17e   :  { %v671_v48 = vadd.f32 %v670_v47, %v669_v42 }
 0x180   :  { %v616_v50 = vpop.f32.mrf.mxu1 }
 0x181   :  { %v617_v31 = vadd.f32 %v616_v50, %v552_v9  ;;  %v569_v2 = vpop.f32.mrf.mxu0  ;;  %v499_v9 = vadd.f32 %v1219_v28, %v498_v57  ;;  %v507_v10 = vpop.f32.mrf.mxu3 }
 0x182   :  { %v508_v21 = vadd.f32 %v1219_v28, %v507_v10  ;;  %v570_v26 = vadd.f32 %v569_v2, %v505_v16 }
 0x183   :  { %v650_v51 = vmax.f32 %v617_v31, 0.0  ;;  %v564_v12 = vadd.f32 %v563_v59, %v499_v9 }
 0x185   :  { %v672_v52 = vsel %vm399_vm2, %v650_v51, 0.0 }
 0x186   :  { %v1253_v54 = vadd.f32 %v672_v52, %v671_v48 }
 0x188   :  { %v619_v55 = vpop.f32.mrf.mxu1  ;;  %v674_v48 = vrot.slane %v1253_v54, 4 }
 0x189   :  { %v620_v17 = vadd.f32 %v619_v55, %v555_v7  ;;  %v572_v20 = vpop.f32.mrf.mxu0  ;;  %v510_v37 = vpop.f32.mrf.mxu3 }
 0x18a   :  { %v573_v23 = vadd.f32 %v572_v20, %v508_v21  ;;  %v511_v42 = vadd.f32 %v1219_v28, %v510_v37  ;;  %v675_v28 = vadd.f32 %v674_v48, %v1253_v54  ;;  %v822_v54 = vld [vmem:[%s1288_s5] ss:$0 sm:$0xff] }
 0x18b   :  { %v651_v30 = vmax.f32 %v620_v17, 0.0 }
 0x18c   :  { %v676_v60 = vrot.slane %v675_v28, 2 }
 0x18d   :  { %v680_v38 = vsel %vm399_vm2, %v651_v30, 0.0 }
 0x18e   :  { %v677_v63 = vadd.f32 %v676_v60, %v675_v28 }
 0x190   :  { %v622_v58 = vpop.f32.mrf.mxu1  ;;  %v678_v2 = vrot.slane %v677_v63, 1 }
 0x191   :  { %v623_v14 = vadd.f32 %v622_v58, %v558_v8  ;;  %v575_v45 = vpop.f32.mrf.mxu0 }
 0x192   :  { %v576_v50 = vadd.f32 %v575_v45, %v511_v42  ;;  %v679_v5 = vadd.f32 %v678_v2, %v677_v63 }
 0x193   :  { %v652_v22 = vmax.f32 %v623_v14, 0.0 }
 0x195   :  { %v681_v34 = vsel %vm399_vm2, %v652_v22, 0.0 }
 0x196   :  { %v682_v27 = vadd.f32 %v681_v34, %v680_v38 }
 0x198   :  { %v625_v61 = vpop.f32.mrf.mxu1 }
 0x199   :  { %v626_v18 = vadd.f32 %v625_v61, %v561_v11 }
 0x19b   :  { %v653_v32 = vmax.f32 %v626_v18, 0.0 }
 0x19d   :  { %v683_v39 = vsel %vm399_vm2, %v653_v32, 0.0 }
 0x19e   :  { %v684_v29 = vadd.f32 %v683_v39, %v682_v27 }
 0x1a0   :  { %v628_v0 = vpop.f32.mrf.mxu1 }
 0x1a1   :  { %v629_v24 = vadd.f32 %v628_v0, %v564_v12 }
 0x1a3   :  { %v654_v35 = vmax.f32 %v629_v24, 0.0 }
 0x1a5   :  { %v685_v43 = vsel %vm399_vm2, %v654_v35, 0.0 }
 0x1a6   :  { %v686_v49 = vadd.f32 %v685_v43, %v684_v29 }
 0x1a8   :  { %v631_v3 = vpop.f32.mrf.mxu1 }
 0x1a9   :  { %v632_v33 = vadd.f32 %v631_v3, %v567_v19 }
 0x1ab   :  { %v655_v40 = vmax.f32 %v632_v33, 0.0 }
 0x1ad   :  { %v687_v46 = vsel %vm399_vm2, %v655_v40, 0.0 }
 0x1ae   :  { %v688_v51 = vadd.f32 %v687_v46, %v686_v49 }
 0x1b0   :  { %v634_v15 = vpop.f32.mrf.mxu1 }
 0x1b1   :  { %v635_v36 = vadd.f32 %v634_v15, %v570_v26 }
 0x1b3   :  { %v656_v44 = vmax.f32 %v635_v36, 0.0 }
 0x1b5   :  { %v689_v31 = vsel %vm399_vm2, %v656_v44, 0.0 }
 0x1b6   :  { %v690_v56 = vadd.f32 %v689_v31, %v688_v51 }
 0x1b8   :  { %v637_v25 = vpop.f32.mrf.mxu1 }
 0x1b9   :  { %v638_v41 = vadd.f32 %v637_v25, %v573_v23 }
 0x1bb   :  { %v657_v47 = vmax.f32 %v638_v41, 0.0 }
 0x1bd   :  { %v691_v53 = vsel %vm399_vm2, %v657_v47, 0.0 }
 0x1be   :  { %v692_v58 = vadd.f32 %v691_v53, %v690_v56 }
 0x1c0   :  { %v640_v52 = vpop.f32.mrf.mxu1 }
 0x1c1   :  { %v641_v55 = vadd.f32 %v640_v52, %v576_v50 }
 0x1c3   :  { %v658_v57 = vmax.f32 %v641_v55, 0.0 }
 0x1c5   :  { %v693_v59 = vsel %vm399_vm2, %v658_v57, 0.0 }
 0x1c6   :  { %v694_v61 = vadd.f32 %v693_v59, %v692_v58 }
 0x1c8   :  { %v695_v62 = vrot.slane %v694_v61, 4 }
 0x1ca   :  { %v696_v0 = vadd.f32 %v695_v62, %v694_v61 }
 0x1cc   :  { %v697_v1 = vrot.slane %v696_v0, 2 }
 0x1ce   :  { %v698_v3 = vadd.f32 %v697_v1, %v696_v0 }
 0x1d0   :  { %v699_v4 = vrot.slane %v698_v3, 1 }
 0x1d2   :  { %v700_v6 = vadd.f32 %v699_v4, %v698_v3 }
 0x1d4   :  { %v702_v7 = vsel %vm701_vm3, %v679_v5, %v700_v6 }
 0x1d5   :  { %v703_v8 = vmul.f32 0.015625, %v702_v7 }
 0x1d7   :  { %808 = vmatmul.msk.f32.vlgmr.msra.gmra.mxu2 %vm399_vm2, %v703_v8 }
 0x25a   :  { %v732_v9 = vpop.f32.mrf.mxu2 }
 0x25b   :  { %v733_v10 = vadd.f32 %v822_v54, %v732_v9 }
 0x25d   :  { %736 = vst.msk [vmem:[%s1289_s6] sm:$0x3] %vm735_vm4, %v733_v10 }

</bundles_post_ra>
